<compile_context>
chip_gen: v6e
topology: v6e:2x2x1
jax: 0.10.0
libtpu: 0.0.40
codegen_flags: <defaults>
</compile_context>

<pallas_src>
import functools

import jax
import jax.numpy as jnp
from jax.experimental import pallas as pl
from jax.experimental.pallas import tpu as pltpu

TAU = 1.5
V_THRESHOLD = 1.0
BN_EPS = 1e-5
LANE = 128


def _round_up(x, m):
    return (x + m - 1) // m * m


def fold_conv_bn(w_oi, b, gamma, beta, mean, var):
    """Fold 1x1-conv bias + eval-mode BN into the weight columns and a shift.

    Returns (w_io_bf16 [C_in, C_out], shift_f32 [C_out]) such that
      BN(conv(x)) == x @ w_io + shift   (per-channel, 1x1 conv).
    The BN scale is folded into the weight so the kernel does no per-element mul.
    """
    scale = gamma / jnp.sqrt(var + BN_EPS)
    shift = (b - mean) * scale + beta
    w_io = (w_oi.T.astype(jnp.float32) * scale[None, :]).astype(jnp.bfloat16)
    return w_io, shift.astype(jnp.float32)


def mlp_kernel(x_ref, w1_ref, sh1_ref, w2_ref, sh2_ref, out_ref, v1_ref, v2_ref):
    t = pl.program_id(1)  # inner, sequential time axis

    @pl.when(t == 0)
    def _():
        v1_ref[...] = jnp.zeros_like(v1_ref)
        v2_ref[...] = jnp.zeros_like(v2_ref)

    inv_tau = jnp.float32(1.0 / TAU)

    x = x_ref[0].astype(jnp.float32)  # (TN, C) bf16 in HBM -> f32 for LIF math

    # --- LIF #1: charge, fire (reuse the boolean mask), hard reset ---
    v1 = v1_ref[...] + (x - v1_ref[...]) * inv_tau
    fired1 = v1 >= V_THRESHOLD
    spike1 = fired1.astype(jnp.bfloat16)          # exact 0/1 in bf16
    v1_ref[...] = jnp.where(fired1, 0.0, v1)

    # --- 1x1 conv (+ folded BN scale in weights) + shift ---
    h1 = jnp.dot(spike1, w1_ref[...], preferred_element_type=jnp.float32)
    y1 = h1 + sh1_ref[...]                        # (TN, Ch) f32

    # --- LIF #2 ---
    v2 = v2_ref[...] + (y1 - v2_ref[...]) * inv_tau
    fired2 = v2 >= V_THRESHOLD
    spike2 = fired2.astype(jnp.bfloat16)
    v2_ref[...] = jnp.where(fired2, 0.0, v2)

    # --- 1x1 conv (+ folded BN scale) + shift ---
    h2 = jnp.dot(spike2, w2_ref[...], preferred_element_type=jnp.float32)
    out_ref[0] = (h2 + sh2_ref[...]).astype(out_ref.dtype)


@functools.partial(jax.jit, static_argnames=("tile_n",))
def mlp_forward(x, w1_oi, b1, g1, be1, m1, var1,
                w2_oi, b2, g2, be2, m2, var2, *, tile_n=1024):
    """x: [T, B, C, H, W] f32. w*_oi: PyTorch 1x1-conv weights [C_out, C_in]."""
    T, B, C, H, W = x.shape
    Ch = w1_oi.shape[0]
    Co = w2_oi.shape[0]
    N = B * H * W

    # Fold conv bias + eval-mode BN; cast weights to bf16 for the MXU.
    w1q, sh1 = fold_conv_bn(w1_oi, b1, g1, be1, m1, var1)   # [C, Ch] bf16
    w2q, sh2 = fold_conv_bn(w2_oi, b2, g2, be2, m2, var2)   # [Ch, Co] bf16

    # Row tile: big on large N (amortize per-step overhead, long DMA bursts),
    # ~N/2 on small N so the "parallel" axis has >=2 tiles (feeds both TCs on
    # v7x).  Multiple of 16 for bf16 sublane packing.  Channels stay unpadded
    # in HBM: the BlockSpec last dim equals the full array dim.
    if N >= 2 * tile_n:
        TN = _round_up(tile_n, 16)
    else:
        TN = max(16, _round_up((N + 1) // 2, 16))
    Np = _round_up(N, TN)

    # channels-last flattened view, bf16 in HBM; pad only the row dim.
    xk = jnp.transpose(x, (0, 1, 3, 4, 2)).reshape(T, N, C).astype(jnp.bfloat16)
    if Np != N:
        xk = jnp.pad(xk, ((0, 0), (0, Np - N), (0, 0)))
    sh1p = sh1.reshape(1, Ch)
    sh2p = sh2.reshape(1, Co)

    # VMEM budget (lane-padded widths, since that is what VMEM actually holds):
    # persistent membranes + double-buffered bf16 I/O + double-buffered weights
    # + live elementwise temporaries (x, v, spike, h, y blocks).  Capped at
    # 48 MiB so the same code fits v7x's 64 MiB/TC.
    Cp, Chp, Cop = (_round_up(c, LANE) for c in (C, Ch, Co))
    membranes = (TN * Cp + TN * Chp) * 4
    io_b = 2 * TN * Cp * 2 + 2 * TN * Cop * 2
    w_b = 2 * (Cp * Chp + Chp * Cop) * 2 + 2 * (Chp + Cop) * 4
    tmp_b = 6 * TN * max(Cp, Chp) * 4
    need = membranes + io_b + w_b + tmp_b
    vmem_limit = int(min(max(need * 3 // 2 + (4 << 20), 16 << 20), 48 << 20))

    out = pl.pallas_call(
        mlp_kernel,
        out_shape=jax.ShapeDtypeStruct((T, Np, Co), jnp.bfloat16),
        grid_spec=pltpu.PrefetchScalarGridSpec(
            num_scalar_prefetch=0,
            grid=(Np // TN, T),                     # (parallel N tiles, time)
            in_specs=[
                pl.BlockSpec((1, TN, C), lambda n, t: (t, n, 0)),
                pl.BlockSpec((C, Ch), lambda n, t: (0, 0)),
                pl.BlockSpec((1, Ch), lambda n, t: (0, 0)),
                pl.BlockSpec((Ch, Co), lambda n, t: (0, 0)),
                pl.BlockSpec((1, Co), lambda n, t: (0, 0)),
            ],
            out_specs=pl.BlockSpec((1, TN, Co), lambda n, t: (t, n, 0)),
            scratch_shapes=[
                pltpu.VMEM((TN, C), jnp.float32),   # membrane of LIF #1
                pltpu.VMEM((TN, Ch), jnp.float32),  # membrane of LIF #2
            ],
        ),
        compiler_params=pltpu.CompilerParams(
            dimension_semantics=("parallel", "arbitrary"),
            vmem_limit_bytes=vmem_limit,
        ),
    )(xk, w1q, sh1p, w2q, sh2p)

    # drop row padding, back to [T, B, Co, H, W]
    out = out[:, :N, :].reshape(T, B, H, W, Co)
    return jnp.transpose(out, (0, 1, 4, 2, 3))


# ------------------------ pure-JAX reference ------------------------
def _lif_multistep(x):
    def step(v, xt):
        v = v + (xt - v) / TAU
        spike = (v >= V_THRESHOLD).astype(x.dtype)
        v = jnp.where(spike > 0, 0.0, v)
        return v, spike

    _, spikes = jax.lax.scan(step, jnp.zeros_like(x[0]), x)
    return spikes


def ref_forward(x, w1q, sh1, w2q, sh2):
    """LIF -> (1x1 conv + folded eval-BN) -> LIF -> (1x1 conv + folded eval-BN).

    Uses the same bf16-rounded folded weights (and bf16-rounded input) as the
    kernel so the binary spike decisions of both LIF layers match; the BN/bias
    fold itself is an exact algebraic identity (see fold_conv_bn).
    """
    T, B, C, H, W = x.shape
    xk = jnp.transpose(x, (0, 1, 3, 4, 2)).reshape(T, B * H * W, C)
    xk = xk.astype(jnp.bfloat16).astype(jnp.float32)   # kernel stores x as bf16
    s1 = _lif_multistep(xk)
    y1 = s1 @ w1q.astype(jnp.float32) + sh1[None, None, :]
    s2 = _lif_multistep(y1)
    y2 = s2 @ w2q.astype(jnp.float32) + sh2[None, None, :]
    Co = w2q.shape[1]
    return jnp.transpose(y2.reshape(T, B, H, W, Co), (0, 1, 4, 2, 3))


if __name__ == "__main__":
    T, B, C, H, W = 4, 2, 16, 8, 8
    hidden = 32
    out_c = C  # out_features defaults to in_features

    key = jax.random.PRNGKey(0)
    ks = jax.random.split(key, 13)

    x = jax.random.normal(ks[0], (T, B, C, H, W), jnp.float32) * 1.5

    # conv1: PyTorch weight [hidden, C, 1, 1] -> stored as [hidden, C]
    w1_oi = jax.random.normal(ks[1], (hidden, C), jnp.float32) * (1.0 / C ** 0.5)
    b1 = jax.random.normal(ks[2], (hidden,), jnp.float32) * 0.1
    g1 = 1.0 + 0.1 * jax.random.normal(ks[3], (hidden,), jnp.float32)
    be1 = 0.1 * jax.random.normal(ks[4], (hidden,), jnp.float32)
    m1 = 0.1 * jax.random.normal(ks[5], (hidden,), jnp.float32)
    v1 = jnp.abs(jax.random.normal(ks[6], (hidden,), jnp.float32)) + 0.5

    # conv2: PyTorch weight [out_c, hidden, 1, 1] -> stored as [out_c, hidden]
    w2_oi = jax.random.normal(ks[7], (out_c, hidden), jnp.float32) * (1.0 / hidden ** 0.5)
    b2 = jax.random.normal(ks[8], (out_c,), jnp.float32) * 0.1
    g2 = 1.0 + 0.1 * jax.random.normal(ks[9], (out_c,), jnp.float32)
    be2 = 0.1 * jax.random.normal(ks[10], (out_c,), jnp.float32)
    m2 = 0.1 * jax.random.normal(ks[11], (out_c,), jnp.float32)
    v2 = jnp.abs(jax.random.normal(ks[12], (out_c,), jnp.float32)) + 0.5

    out = mlp_forward(x, w1_oi, b1, g1, be1, m1, v1,
                      w2_oi, b2, g2, be2, m2, v2)
    out = jax.block_until_ready(out)

    # Reference built from the same folded / bf16-rounded parameters & input.
    w1q, sh1 = fold_conv_bn(w1_oi, b1, g1, be1, m1, v1)
    w2q, sh2 = fold_conv_bn(w2_oi, b2, g2, be2, m2, v2)
    ref = ref_forward(x, w1q, sh1, w2q, sh2)

    assert out.shape == (T, B, out_c, H, W), out.shape
    out_f = out.astype(jnp.float32)
    # Tolerance covers the bf16 rounding of the stored output (review item:
    # bf16 I/O) plus f32 accumulation-order differences in the MXU matmuls.
    err = float(jnp.max(jnp.abs(out_f - ref)))
    assert jnp.allclose(out_f, ref, atol=3e-2, rtol=3e-2), err

    print("KERNEL_OK")
</pallas_src>

<mosaic_0001>
module attributes {stable_mosaic.version = 11 : i64} {
  func.func @mlp_kernel(%arg0: i32, %arg1: i32, %arg2: memref<1x64x16xbf16, #tpu.memory_space<vmem>>, %arg3: memref<16x32xbf16, #tpu.memory_space<vmem>>, %arg4: memref<1x32xf32, #tpu.memory_space<vmem>>, %arg5: memref<32x16xbf16, #tpu.memory_space<vmem>>, %arg6: memref<1x16xf32, #tpu.memory_space<vmem>>, %arg7: memref<1x64x16xbf16, #tpu.memory_space<vmem>>, %arg8: memref<64x16xf32, #tpu.memory_space<vmem>>, %arg9: memref<64x32xf32, #tpu.memory_space<vmem>>) attributes {dimension_semantics = [#tpu.dimension_semantics<parallel>, #tpu.dimension_semantics<arbitrary>], iteration_bounds = array<i64: 2, 4>, scalar_prefetch = 0 : i64, scratch_operands = 2 : i64, tpu.core_type = #tpu.core_type<tc>, window_params = [{transform_indices = @transform_0, window_bounds = array<i64: 1, 64, 16>}, {pipeline_mode = #tpu.pipeline_mode<synchronous>, transform_indices = @transform_1, window_bounds = array<i64: 16, 32>}, {pipeline_mode = #tpu.pipeline_mode<synchronous>, transform_indices = @transform_2, window_bounds = array<i64: 1, 32>}, {pipeline_mode = #tpu.pipeline_mode<synchronous>, transform_indices = @transform_3, window_bounds = array<i64: 32, 16>}, {pipeline_mode = #tpu.pipeline_mode<synchronous>, transform_indices = @transform_4, window_bounds = array<i64: 1, 16>}, {transform_indices = @transform_5, window_bounds = array<i64: 1, 64, 16>}]} {
    %c0_i32 = arith.constant 0 : i32
    %0 = arith.cmpi eq, %arg1, %c0_i32 : i32
    %1 = arith.extui %0 : i1 to i32
    %c0_i32_0 = arith.constant 0 : i32
    %2 = arith.cmpi ne, %1, %c0_i32_0 : i32
    scf.if %2 {
      %cst_33 = arith.constant 0.000000e+00 : f32
      %48 = vector.broadcast %cst_33 : f32 to vector<64x16xf32>
      %c0_34 = arith.constant 0 : index
      %c0_35 = arith.constant 0 : index
      %49 = vector.load %arg8[%c0_34, %c0_35] : memref<64x16xf32, #tpu.memory_space<vmem>>, vector<64x16xf32>
      tpu.vector_store %arg8[%c0_34, %c0_35], %48 {strides = array<i32>} : memref<64x16xf32, #tpu.memory_space<vmem>>, vector<64x16xf32>,
      %cst_36 = arith.constant 0.000000e+00 : f32
      %50 = vector.broadcast %cst_36 : f32 to vector<64x32xf32>
      %c0_37 = arith.constant 0 : index
      %c0_38 = arith.constant 0 : index
      %51 = vector.load %arg9[%c0_37, %c0_38] : memref<64x32xf32, #tpu.memory_space<vmem>>, vector<64x32xf32>
      tpu.vector_store %arg9[%c0_37, %c0_38], %50 {strides = array<i32>} : memref<64x32xf32, #tpu.memory_space<vmem>>, vector<64x32xf32>,
    } else {
    }
    %c0 = arith.constant 0 : index
    %c0_1 = arith.constant 0 : index
    %c0_2 = arith.constant 0 : index
    %3 = vector.load %arg2[%c0, %c0_1, %c0_2] : memref<1x64x16xbf16, #tpu.memory_space<vmem>>, vector<1x64x16xbf16>
    %4 = vector.shape_cast %3 : vector<1x64x16xbf16> to vector<64x16xbf16>
    %5 = arith.extf %4 : vector<64x16xbf16> to vector<64x16xf32>
    %c0_3 = arith.constant 0 : index
    %c0_4 = arith.constant 0 : index
    %6 = vector.load %arg8[%c0_3, %c0_4] : memref<64x16xf32, #tpu.memory_space<vmem>>, vector<64x16xf32>
    %c0_5 = arith.constant 0 : index
    %c0_6 = arith.constant 0 : index
    %7 = vector.load %arg8[%c0_5, %c0_6] : memref<64x16xf32, #tpu.memory_space<vmem>>, vector<64x16xf32>
    %8 = arith.subf %5, %7 : vector<64x16xf32>
    %cst = arith.constant 0.666666686 : f32
    %9 = vector.broadcast %cst : f32 to vector<64x16xf32>
    %10 = arith.mulf %8, %9 : vector<64x16xf32>
    %11 = arith.addf %6, %10 : vector<64x16xf32>
    %cst_7 = arith.constant 1.000000e+00 : f32
    %12 = vector.broadcast %cst_7 : f32 to vector<64x16xf32>
    %13 = arith.cmpf oge, %11, %12 : vector<64x16xf32>
    %14 = arith.extui %13 : vector<64x16xi1> to vector<64x16xi32>
    %15 = arith.sitofp %14 : vector<64x16xi32> to vector<64x16xf32>
    %16 = arith.truncf %15 : vector<64x16xf32> to vector<64x16xbf16>
    %cst_8 = arith.constant 0.000000e+00 : f32
    %17 = vector.broadcast %cst_8 : f32 to vector<64x16xf32>
    %18 = arith.select %13, %17, %11 : vector<64x16xi1>, vector<64x16xf32>
    %c0_9 = arith.constant 0 : index
    %c0_10 = arith.constant 0 : index
    %19 = vector.load %arg8[%c0_9, %c0_10] : memref<64x16xf32, #tpu.memory_space<vmem>>, vector<64x16xf32>
    tpu.vector_store %arg8[%c0_9, %c0_10], %18 {strides = array<i32>} : memref<64x16xf32, #tpu.memory_space<vmem>>, vector<64x16xf32>,
    %c0_11 = arith.constant 0 : index
    %c0_12 = arith.constant 0 : index
    %20 = vector.load %arg3[%c0_11, %c0_12] : memref<16x32xbf16, #tpu.memory_space<vmem>>, vector<16x32xbf16>
    %cst_13 = arith.constant dense<0.000000e+00> : vector<64x32xf32>
    %21 = tpu.matmul %16, %20, %cst_13 {dimension_numbers = #tpu.dot_dimension_numbers<[1], [0], [0], [1], [0, 0, 1, 1], [], []>} : vector<64x16xbf16>, vector<16x32xbf16>, vector<64x32xf32> -> vector<64x32xf32>
    %c0_14 = arith.constant 0 : index
    %c0_15 = arith.constant 0 : index
    %22 = vector.load %arg4[%c0_14, %c0_15] : memref<1x32xf32, #tpu.memory_space<vmem>>, vector<1x32xf32>
    %23 = vector.broadcast %22 : vector<1x32xf32> to vector<64x32xf32>
    %24 = arith.addf %21, %23 : vector<64x32xf32>
    %c0_16 = arith.constant 0 : index
    %c0_17 = arith.constant 0 : index
    %25 = vector.load %arg9[%c0_16, %c0_17] : memref<64x32xf32, #tpu.memory_space<vmem>>, vector<64x32xf32>
    %c0_18 = arith.constant 0 : index
    %c0_19 = arith.constant 0 : index
    %26 = vector.load %arg9[%c0_18, %c0_19] : memref<64x32xf32, #tpu.memory_space<vmem>>, vector<64x32xf32>
    %27 = arith.subf %24, %26 : vector<64x32xf32>
    %cst_20 = arith.constant 0.666666686 : f32
    %28 = vector.broadcast %cst_20 : f32 to vector<64x32xf32>
    %29 = arith.mulf %27, %28 : vector<64x32xf32>
    %30 = arith.addf %25, %29 : vector<64x32xf32>
    %cst_21 = arith.constant 1.000000e+00 : f32
    %31 = vector.broadcast %cst_21 : f32 to vector<64x32xf32>
    %32 = arith.cmpf oge, %30, %31 : vector<64x32xf32>
    %33 = arith.extui %32 : vector<64x32xi1> to vector<64x32xi32>
    %34 = arith.sitofp %33 : vector<64x32xi32> to vector<64x32xf32>
    %35 = arith.truncf %34 : vector<64x32xf32> to vector<64x32xbf16>
    %cst_22 = arith.constant 0.000000e+00 : f32
    %36 = vector.broadcast %cst_22 : f32 to vector<64x32xf32>
    %37 = arith.select %32, %36, %30 : vector<64x32xi1>, vector<64x32xf32>
    %c0_23 = arith.constant 0 : index
    %c0_24 = arith.constant 0 : index
    %38 = vector.load %arg9[%c0_23, %c0_24] : memref<64x32xf32, #tpu.memory_space<vmem>>, vector<64x32xf32>
    tpu.vector_store %arg9[%c0_23, %c0_24], %37 {strides = array<i32>} : memref<64x32xf32, #tpu.memory_space<vmem>>, vector<64x32xf32>,
    %c0_25 = arith.constant 0 : index
    %c0_26 = arith.constant 0 : index
    %39 = vector.load %arg5[%c0_25, %c0_26] : memref<32x16xbf16, #tpu.memory_space<vmem>>, vector<32x16xbf16>
    %cst_27 = arith.constant dense<0.000000e+00> : vector<64x16xf32>
    %40 = tpu.matmul %35, %39, %cst_27 {dimension_numbers = #tpu.dot_dimension_numbers<[1], [0], [0], [1], [0, 0, 1, 1], [], []>} : vector<64x32xbf16>, vector<32x16xbf16>, vector<64x16xf32> -> vector<64x16xf32>
    %c0_28 = arith.constant 0 : index
    %c0_29 = arith.constant 0 : index
    %41 = vector.load %arg6[%c0_28, %c0_29] : memref<1x16xf32, #tpu.memory_space<vmem>>, vector<1x16xf32>
    %42 = vector.broadcast %41 : vector<1x16xf32> to vector<64x16xf32>
    %43 = arith.addf %40, %42 : vector<64x16xf32>
    %44 = arith.truncf %43 : vector<64x16xf32> to vector<64x16xbf16>
    %c0_30 = arith.constant 0 : index
    %c0_31 = arith.constant 0 : index
    %c0_32 = arith.constant 0 : index
    %45 = vector.load %arg7[%c0_30, %c0_31, %c0_32] : memref<1x64x16xbf16, #tpu.memory_space<vmem>>, vector<1x64x16xbf16>
    %46 = vector.shape_cast %45 : vector<1x64x16xbf16> to vector<64x16xbf16>
    %47 = vector.shape_cast %44 : vector<64x16xbf16> to vector<1x64x16xbf16>
    tpu.vector_store %arg7[%c0_30, %c0_31, %c0_32], %47 {strides = array<i32>} : memref<1x64x16xbf16, #tpu.memory_space<vmem>>, vector<1x64x16xbf16>,
    return
  }
  func.func @transform_0(%arg0: i32, %arg1: i32) -> (i32, i32, i32) {
    %c0_i32 = arith.constant 0 : i32
    %c0_i32_0 = arith.constant 0 : i32
    return %arg1, %arg0, %c0_i32 : i32, i32, i32
  }
  func.func @transform_1(%arg0: i32, %arg1: i32) -> (i32, i32) {
    %c0_i32 = arith.constant 0 : i32
    %c0_i32_0 = arith.constant 0 : i32
    %c0_i32_1 = arith.constant 0 : i32
    return %c0_i32, %c0_i32_0 : i32, i32
  }
  func.func @transform_2(%arg0: i32, %arg1: i32) -> (i32, i32) {
    %c0_i32 = arith.constant 0 : i32
    %c0_i32_0 = arith.constant 0 : i32
    %c0_i32_1 = arith.constant 0 : i32
    return %c0_i32, %c0_i32_0 : i32, i32
  }
  func.func @transform_3(%arg0: i32, %arg1: i32) -> (i32, i32) {
    %c0_i32 = arith.constant 0 : i32
    %c0_i32_0 = arith.constant 0 : i32
    %c0_i32_1 = arith.constant 0 : i32
    return %c0_i32, %c0_i32_0 : i32, i32
  }
  func.func @transform_4(%arg0: i32, %arg1: i32) -> (i32, i32) {
    %c0_i32 = arith.constant 0 : i32
    %c0_i32_0 = arith.constant 0 : i32
    %c0_i32_1 = arith.constant 0 : i32
    return %c0_i32, %c0_i32_0 : i32, i32
  }
  func.func @transform_5(%arg0: i32, %arg1: i32) -> (i32, i32, i32) {
    %c0_i32 = arith.constant 0 : i32
    %c0_i32_0 = arith.constant 0 : i32
    return %arg1, %arg0, %c0_i32 : i32, i32, i32
  }
}

</mosaic_0001>

<bundles_post_ra>
// kernel: mlp_forward.1
= control target key start
LH: loop header
LB: loop body
LE: loop exit
PB: predicated region body
PF: predicated region fallthrough
CT: control target
= control target key end

     0   :  { %10 = vsyncpa [#allocation5], 0  ;;  %s1339_s0 = inlined_call_operand.vmem [shape: bf16[4,128,16], index: 0, kind: input, shape index: {}]   ;;  %s1340_s1 = inlined_call_operand.vmem [shape: bf16[16,32], index: 1, kind: input, shape index: {}]   ;;  %s1341_s2 = inlined_call_operand.vmem [shape: f32[1,32], index: 2, kind: input, shape index: {}]   ;;  %s1342_s3 = inlined_call_operand.vmem [shape: bf16[32,16], index: 3, kind: input, shape index: {}]   ;;  %s1343_s4 = inlined_call_operand.vmem [shape: f32[1,16], index: 4, kind: input, shape index: {}]   ;;  %s1344_s5 = inlined_call_operand.hbm [shape: bf16[4,128,16], index: 5, kind: output, shape index: {}]  }
   0x1   :  { %12 = vsyncpa [#allocation5 + $0x1], 0  ;;  %s1098_s18 = smov 0   ;;  %s1100_s19 = smov 0  }
   0x2   :  { %s1102_s20 = smov 0   ;;  %s1104_s21 = smov 0  }
   0x3   :  { %s1106_s22 = smov 0   ;;  %s1108_s23 = smov 0  }
   0x4   :  { %s1110_s24 = smov 0   ;;  %s1112_s25 = smov 0  }
   0x5 LB: > { %s778_s26 = sadd.s32 4294967295, %s1061_s25   ;;  %s779_s27 = sadd.s32 4294967294, %s1061_s25   ;;  %s1061_s25 = sphi %s1112_s25, %s18_s25   ;;  %s1057_s24 = sphi %s1110_s24, %s1353_s24   ;;  %s1053_s23 = sphi %s1108_s23, %s1352_s23   ;;  %s1049_s22 = sphi %s1106_s22, %s1351_s22   ;;  %s1045_s21 = sphi %s1104_s21, %s1350_s21   ;;  %s1041_s20 = sphi %s1102_s20, %s1349_s20   ;;  %s1037_s19 = sphi %s1100_s19, %s1348_s19   ;;  %s1033_s18 = sphi %s1098_s18, %s1347_s18  }
   0x6   : > { %s27_s28 = sadd.s32 1, %s1053_s23  ;;  %s30_s29 = sadd.s32 1, %s1057_s24 }
   0x7   : > { %p28_p0 = scmp.ge.s32.totalorder %s27_s28, 4  ;;  %p161_p1 = scmp.ne.s32.totalorder %s1041_s20, %s1037_s19 }
   0x8   : > { %p162_p2 = scmp.eq.s32.totalorder %s778_s26, 7  ;;  %p167_p5 = scmp.ne.s32.totalorder %s1037_s19, %s1033_s18 }
   0x9   : > { %s1355_s28 = smov (%p28_p0, %s27_s28), 0  ;;  %s1357_s29 = smov (!%p28_p0, %s30_s29), %s1057_s24 }
   0xa   : > { %s146_s30 = ssub.s32 %s1053_s23, %s1355_s28  ;;  %p1149_p3 = por %p162_p2, %p161_p1 }
   0xb   : > { %p32_p4 = scmp.ge.s32.totalorder %s1357_s29, 2  ;;  %p168_p6 = scmp.eq.s32.totalorder %s779_s27, 7 }
   0xc   : > { %p782_p7 = scmp.ge.s32.totalorder %s1061_s25, 1  ;;  %p211_p9 = scmp.lt.s32.totalorder %s1061_s25, 9 }
   0xd   : > { %s1359_s29 = smov (%p32_p4, %s1357_s29), 0  ;;  %p1158_p8 = por %p168_p6, %p167_p5 }
   0xe   : > { %s147_s8 = ssub.s32 %s1057_s24, %s1359_s29  ;;  %s151_s9 = sadd.s32 1, %s1041_s20 }
   0xf   : > { %s148_s10 = sor.u32 %s147_s8, %s146_s30  ;;  %p212_p10 = pnand %p782_p7, %p211_p9 }
  0x10   : > { %p149_p11 = scmp.eq.s32.totalorder %s148_s10, 0  ;;  %s240_s12 = sand.u32 (!%p212_p10), 1, %s1037_s19  }
  0x11   : > { %215 = sbr.rel (%p212_p10) target bundleno = 491 (0x1eb), region = 40  ;;  %s1171_s13 = sshll.u32 (!%p212_p10), %s1049_s22, 3 }
  0x12   : > { %s1167_s11 = scalar_select %p149_p11, %s1041_s20, %s151_s9  }
  0x13   : > { %s783_s14 = sshll.u32 (!%p212_p10), %s240_s12, 5  ;;  %p244_p12 = scmp.lt.s32.totalorder (!%p212_p10), %s1045_s21, 3 }
  0x14   : > { %p246_p13 = scmp.lt.s32.totalorder (!%p212_p10), %s1171_s13, 15  ;;  %s1184_s10 = scalar_lea.vmem (!%p212_p10), [#allocation4], %s783_s14 }
  0x15   : > { %p787_p0 = scmp.ne.s32.totalorder (!%p212_p10), %s1045_s21, 0 }
  0x16   : > { %s245_s15 = scalar_select %p244_p12, %s1045_s21, 3 }
  0x17   : > { %s247_s16 = scalar_select %p246_p13, %s1171_s13, 15 }
  0x18   : > { %s785_s17 = sshll.u32 %s245_s15, 4  ;;  %258 = sbr.rel (%p787_p0) target bundleno = 38 (0x26), region = 44 }
  0x19   : > { %s249_s26 = sadd.s32 %s785_s17, %s247_s16 }
  0x1a   : > { %s786_s27 = sshll.u32 %s249_s26, 2 }
  0x1b   : > { %s1182_s9 = scalar_lea.vmem %s1339_s0, %s786_s27 }
  0x1d   : > { %vm259_vm0 = vcmask 130048   ;;  %vm268_vm1 = vcmask 261120   ;;  %v1063_v0 = vmov 0.0  }
  0x1e   : > { %260 = vst.msk [vmem:[#allocation2] sm:$0xff] %vm259_vm0, %v1063_v0  ;;  %261 = vst.msk [vmem:[#allocation2 + $0x8] sm:$0xff] %vm259_vm0, %v1063_v0 }
  0x1f   : > { %262 = vst.msk [vmem:[#allocation2 + $0x10] sm:$0xff] %vm259_vm0, %v1063_v0  ;;  %263 = vst.msk [vmem:[#allocation2 + $0x18] sm:$0xff] %vm259_vm0, %v1063_v0 }
  0x20   : > { %264 = vst.msk [vmem:[#allocation2 + $0x20] sm:$0xff] %vm259_vm0, %v1063_v0  ;;  %265 = vst.msk [vmem:[#allocation2 + $0x28] sm:$0xff] %vm259_vm0, %v1063_v0 }
  0x21   : > { %266 = vst.msk [vmem:[#allocation2 + $0x30] sm:$0xff] %vm259_vm0, %v1063_v0  ;;  %267 = vst.msk [vmem:[#allocation2 + $0x38] sm:$0xff] %vm259_vm0, %v1063_v0 }
  0x22   : > { %269 = vst.msk [vmem:[#allocation3] sm:$0xff] %vm268_vm1, %v1063_v0  ;;  %270 = vst.msk [vmem:[#allocation3 + $0x8] sm:$0xff] %vm268_vm1, %v1063_v0 }
  0x23   : > { %271 = vst.msk [vmem:[#allocation3 + $0x10] sm:$0xff] %vm268_vm1, %v1063_v0  ;;  %272 = vst.msk [vmem:[#allocation3 + $0x18] sm:$0xff] %vm268_vm1, %v1063_v0 }
  0x24   : > { %273 = vst.msk [vmem:[#allocation3 + $0x20] sm:$0xff] %vm268_vm1, %v1063_v0  ;;  %274 = vst.msk [vmem:[#allocation3 + $0x28] sm:$0xff] %vm268_vm1, %v1063_v0 }
  0x25   : > { %275 = vst.msk [vmem:[#allocation3 + $0x30] sm:$0xff] %vm268_vm1, %v1063_v0  ;;  %276 = vst.msk [vmem:[#allocation3 + $0x38] sm:$0xff] %vm268_vm1, %v1063_v0 }
  0x26 PF: > { %v966_v1 = vld [vmem:[%s1340_s1] sm:$0xff]   ;;  %v294_v4 = vld [vmem:[#allocation2 + $0x8] sm:$0xff]  ;;  %v295_v8 = vld [vmem:[#allocation2 + $0x10] sm:$0xff]  ;;  %vm361_vm2 = vcmask 130048   ;;  %v1064_v44 = vmov 0.0   ;;  %vm530_vm11 = vcmask 261120  }
  0x27   : > { %v840_v2 = vld [vmem:[%s1182_s9] sm:$0xff]   ;;  %869 = vmatprep.subr.bf16.mxu0 %v966_v1  ;;  %v855_v7 = vld [vmem:[%s1182_s9 + $0x8] sm:$0xff]   ;;  %v296_v9 = vld [vmem:[#allocation2 + $0x18] sm:$0xff]  ;;  %s827_s22 = sshll.u32 %s1045_s21, 4  ;;  %s696_s15 = sshll.u32 %s1184_s10, 4  ;;  %s1280_s15 = int_to_ptr.vmem [resolvable:$true] %s696_s15 }
  0x28   : > { %v293_v3 = vld [vmem:[#allocation2] sm:$0xff]  ;;  %v841_v5 = vunpack.c.l.bf16 %v840_v2  ;;  %v842_v6 = vunpack.c.h.bf16 %v840_v2  ;;  %870 = vmatpush3.bf16.msra.mxu0 %v966_v1  ;;  %v845_v10 = vunpack.c.l.bf16 %v855_v7  ;;  %v846_v11 = vunpack.c.h.bf16 %v855_v7  ;;  %v856_v12 = vld [vmem:[%s1182_s9 + $0x10] sm:$0xff]   ;;  %v298_v14 = vld [vmem:[#allocation2 + $0x28] sm:$0xff]  ;;  %s693_s14 = sadd.s32 %s827_s22, %s1171_s13  ;;  %s1288_s26 = scalar_lea.sflag [#allocation5], %s240_s12 }
  0x29   : > { %v297_v13 = vld [vmem:[#allocation2 + $0x20] sm:$0xff]  ;;  %v849_v17 = vunpack.c.l.bf16 %v856_v12  ;;  %v850_v18 = vunpack.c.h.bf16 %v856_v12  ;;  %v857_v19 = vld [vmem:[%s1182_s9 + $0x18] sm:$0xff]   ;;  %v299_v20 = vld [vmem:[#allocation2 + $0x30] sm:$0xff]  ;;  %s828_s21 = sshll.u32 %s693_s14, 6  ;;  %s969_s27 = scalar_lea.vmem %s1280_s15, 512 }
  0x2a   : > { %v301_v15 = vsub.f32 %v841_v5, %v293_v3  ;;  %v302_v16 = vsub.f32 %v842_v6, %v294_v4  ;;  %v300_v21 = vld [vmem:[#allocation2 + $0x38] sm:$0xff]  ;;  %v303_v22 = vsub.f32 %v845_v10, %v295_v8  ;;  %v304_v23 = vsub.f32 %v846_v11, %v296_v9  ;;  %v796_v5 = vld [vmem:[%s1341_s2] ss:$0 sm:$0xff]  ;;  %v464_v7 = vld [vmem:[#allocation3 + $0x10] sm:$0xff]  ;;  %s1278_s13 = scalar_lea.hbm %s1344_s5, %s828_s21  ;;  %p970_p1 = scmp.ne.s32.totalorder %s1280_s15, %s969_s27 }
  0x2b   : > { %v853_v24 = vunpack.c.l.bf16 %v857_v19  ;;  %v854_v25 = vunpack.c.h.bf16 %v857_v19  ;;  %v305_v28 = vsub.f32 %v849_v17, %v297_v13  ;;  %v306_v29 = vsub.f32 %v850_v18, %v298_v14  ;;  %v462_v10 = vld [vmem:[#allocation3] sm:$0xff]  ;;  %v463_v19 = vld [vmem:[#allocation3 + $0x8] sm:$0xff]  ;;  %s1065_s30 = smov [#allocation4]  }
  0x2c   : > { %v309_v26 = vmul.f32 0.6666667, %v301_v15  ;;  %v310_v27 = vmul.f32 0.6666667, %v302_v16  ;;  %v311_v30 = vmul.f32 0.6666667, %v303_v22  ;;  %p971_p2 = pnand %p970_p1, %p1149_p3 }
  0x2d   : > { %v312_v31 = vmul.f32 0.6666667, %v304_v23  ;;  %v307_v32 = vsub.f32 %v853_v24, %v299_v20  ;;  %v308_v33 = vsub.f32 %v854_v25, %v300_v21  ;;  %v313_v36 = vmul.f32 0.6666667, %v305_v28  ;;  %v468_v28 = vld [vmem:[#allocation3 + $0x30] sm:$0xff]  ;;  %s973_s8 = sshll.u32 %s1065_s30, 4  ;;  %s974_s8 = int_to_ptr.vmem [resolvable:$false] %s973_s8 }
  0x2e   : > { %v317_v34 = vadd.f32 %v309_v26, %v293_v3  ;;  %v318_v35 = vadd.f32 %v310_v27, %v294_v4  ;;  %v314_v37 = vmul.f32 0.6666667, %v306_v29  ;;  %v319_v38 = vadd.f32 %v311_v30, %v295_v8  ;;  %v967_v3 = vld [vmem:[%s1342_s3 + $0x8] sm:$0xff]   ;;  %v968_v4 = vld [vmem:[%s1342_s3] sm:$0xff]   ;;  %p972_p4 = pneg %p971_p2  ;;  %s975_s9 = scalar_lea.vmem %s974_s8, 1024 }
  0x2f   : > { %v320_v39 = vadd.f32 %v312_v31, %v296_v9  ;;  %v315_v40 = vmul.f32 0.6666667, %v307_v32  ;;  %v316_v41 = vmul.f32 0.6666667, %v308_v33  ;;  %v321_v42 = vadd.f32 %v313_v36, %v297_v13  ;;  %879 = vmatprep.subr.bf16.mxu1 %v967_v3  ;;  %v466_v32 = vld [vmem:[#allocation3 + $0x20] sm:$0xff]  ;;  %p976_p5 = scmp.lt.s32.totalorder %s1280_s15, %s974_s8  ;;  %p977_p6 = scmp.lt.s32.totalorder %s975_s9, %s969_s27 }
  0x30   : > { %vm325_vm3 = vcmp.ge.f32.partialorder %v317_v34, 1.0  ;;  %vm326_vm4 = vcmp.ge.f32.partialorder %v318_v35, 1.0  ;;  %v322_v43 = vadd.f32 %v314_v37, %v298_v14  ;;  %vm327_vm5 = vcmp.ge.f32.partialorder %v319_v38, 1.0  ;;  %880 = vmatpush3.bf16.msra.mxu1 %v967_v3  ;;  %v465_v14 = vld [vmem:[#allocation3 + $0x18] sm:$0xff] }
  0x31   : > { %v788_v45 = vsel %vm325_vm3, 1.0, %v1064_v44  ;;  %v789_v46 = vsel %vm326_vm4, 1.0, %v1064_v44  ;;  %v353_v47 = vsel %vm325_vm3, 0.0, %v317_v34  ;;  %v354_v48 = vsel %vm326_vm4, 0.0, %v318_v35  ;;  %881 = vmatprep.subr.bf16.mxu1 %v968_v4  ;;  %p978_p7 = por %p977_p6, %p976_p5 }
  0x32   : > { %v349_v49 = vpack.c.bf16 %v789_v46, %v788_v45  ;;  %362 = vst.msk [vmem:[#allocation2] sm:$0xff] %vm361_vm2, %v353_v47  ;;  %363 = vst.msk [vmem:[#allocation2 + $0x8] sm:$0xff] %vm361_vm2, %v354_v48  ;;  %vm328_vm6 = vcmp.ge.f32.partialorder %v320_v39, 1.0  ;;  %vm329_vm7 = vcmp.ge.f32.partialorder %v321_v42, 1.0  ;;  %v790_v50 = vsel %vm327_vm5, 1.0, %v1064_v44 }
  0x33   : > { %v791_v51 = vsel %vm328_vm6, 1.0, %v1064_v44  ;;  %v355_v52 = vsel %vm327_vm5, 0.0, %v319_v38  ;;  %v356_v53 = vsel %vm328_vm6, 0.0, %v320_v39  ;;  %vm330_vm8 = vcmp.ge.f32.partialorder %v322_v43, 1.0  ;;  %v469_v38 = vld [vmem:[#allocation3 + $0x38] sm:$0xff]  ;;  %p979_p9 = pnand %p978_p7, %p972_p4 }
  0x34   : > { %871 = vmatprep.mubr.msk.bf16.mxu0 %vm361_vm2, %v349_v49  ;;  %v350_v54 = vpack.c.bf16 %v791_v51, %v790_v50  ;;  %364 = vst.msk [vmem:[#allocation2 + $0x10] sm:$0xff] %vm361_vm2, %v355_v52  ;;  %365 = vst.msk [vmem:[#allocation2 + $0x18] sm:$0xff] %vm361_vm2, %v356_v53  ;;  %v792_v55 = vsel %vm329_vm7, 1.0, %v1064_v44  ;;  %v357_v56 = vsel %vm329_vm7, 0.0, %v321_v42  ;;  %v793_v57 = vsel %vm330_vm8, 1.0, %v1064_v44  ;;  %882 = vmatpush3.bf16.msra.mxu1 %v968_v4  ;;  %v467_v49 = vld [vmem:[#allocation3 + $0x28] sm:$0xff] }
  0x35   : > { %v358_v58 = vsel %vm330_vm8, 0.0, %v322_v43  ;;  %366 = vst.msk [vmem:[#allocation2 + $0x20] sm:$0xff] %vm361_vm2, %v357_v56  ;;  %v323_v59 = vadd.f32 %v315_v40, %v299_v20  ;;  %v324_v60 = vadd.f32 %v316_v41, %v300_v21  ;;  %v351_v61 = vpack.c.bf16 %v793_v57, %v792_v55 }
  0x36   : > { %872 = vmatmul.mubr.msk.bf16.vlgmr.msra.gmra.mxu0 %vm361_vm2, %v350_v54  ;;  %367 = vst.msk [vmem:[#allocation2 + $0x28] sm:$0xff] %vm361_vm2, %v358_v58  ;;  %vm671_vm4 = vcmask 125952  }
  0x37   : > { %vm331_vm9 = vcmp.ge.f32.partialorder %v323_v59, 1.0  ;;  %vm332_vm10 = vcmp.ge.f32.partialorder %v324_v60, 1.0  ;;  %875 = vmatprep.mubr.msk.bf16.mxu0 %vm361_vm2, %v351_v61 }
  0x38   : > { %v794_v62 = vsel %vm331_vm9, 1.0, %v1064_v44  ;;  %v795_v63 = vsel %vm332_vm10, 1.0, %v1064_v44  ;;  %v359_v0 = vsel %vm331_vm9, 0.0, %v323_v59  ;;  %v360_v1 = vsel %vm332_vm10, 0.0, %v324_v60 }
  0x39   : > { %368 = vst.msk [vmem:[#allocation2 + $0x30] sm:$0xff] %vm361_vm2, %v359_v0  ;;  %369 = vst.msk [vmem:[#allocation2 + $0x38] sm:$0xff] %vm361_vm2, %v360_v1  ;;  %v352_v2 = vpack.c.bf16 %v795_v63, %v794_v62 }
  0x3e   : > { %876 = vmatmul.mubr.msk.bf16.gmra.mxu0 %vm361_vm2, %v352_v2 }
  0xf6   : > { %v873_v6 = vpop.f32.mrf.mxu0 }
  0xf7   : > { %v440_v8 = vadd.f32 %v873_v6, %v796_v5 }
  0xf8   : > { %v431_v9 = vpop.f32.mrf.mxu0 }
  0xf9   : > { %v472_v11 = vsub.f32 %v440_v8, %v464_v7  ;;  %v432_v12 = vadd.f32 %v796_v5, %v431_v9 }
  0xfa   : > { %v874_v13 = vpop.f32.mrf.mxu0 }
  0xfb   : > { %v480_v15 = vmul.f32 0.6666667, %v472_v11  ;;  %v470_v16 = vsub.f32 %v432_v12, %v462_v10  ;;  %v443_v17 = vadd.f32 %v874_v13, %v796_v5  ;;  %v810_v11 = vld [vmem:[%s1343_s4] ss:$0 sm:$0xff] }
  0xfc   : > { %v434_v18 = vpop.f32.mrf.mxu0 }
  0xfd   : > { %v488_v20 = vadd.f32 %v480_v15, %v464_v7  ;;  %v478_v21 = vmul.f32 0.6666667, %v470_v16  ;;  %v473_v22 = vsub.f32 %v443_v17, %v465_v14  ;;  %v435_v23 = vadd.f32 %v796_v5, %v434_v18 }
  0xfe   : > { %v877_v24 = vpop.f32.mrf.mxu0 }
  0xff   : > { %vm496_vm12 = vcmp.ge.f32.partialorder %v488_v20, 1.0  ;;  %v486_v25 = vadd.f32 %v478_v21, %v462_v10  ;;  %v481_v26 = vmul.f32 0.6666667, %v473_v22  ;;  %v471_v27 = vsub.f32 %v435_v23, %v463_v19 }
 0x100   : > { %v524_v29 = vsel %vm496_vm12, 0.0, %v488_v20  ;;  %v456_v30 = vadd.f32 %v877_v24, %v796_v5  ;;  %v447_v31 = vpop.f32.mrf.mxu0  ;;  %v804_v43 = vsel %vm496_vm12, 1.0, %v1064_v44 }
 0x101   : > { %533 = vst.msk [vmem:[#allocation3 + $0x10] sm:$0xff] %vm530_vm11, %v524_v29  ;;  %v489_v33 = vadd.f32 %v481_v26, %v465_v14  ;;  %v479_v34 = vmul.f32 0.6666667, %v471_v27  ;;  %v448_v35 = vadd.f32 %v796_v5, %v447_v31  ;;  %vm494_vm13 = vcmp.ge.f32.partialorder %v486_v25, 1.0 }
 0x102   : > { %v476_v36 = vsub.f32 %v456_v30, %v468_v28  ;;  %v878_v37 = vpop.f32.mrf.mxu0  ;;  %v522_v39 = vsel %vm494_vm13, 0.0, %v486_v25  ;;  %v802_v54 = vsel %vm494_vm13, 1.0, %v1064_v44 }
 0x103   : > { %vm497_vm14 = vcmp.ge.f32.partialorder %v489_v33, 1.0  ;;  %v487_v40 = vadd.f32 %v479_v34, %v463_v19  ;;  %v474_v41 = vsub.f32 %v448_v35, %v466_v32  ;;  %v459_v42 = vadd.f32 %v878_v37, %v796_v5  ;;  %531 = vst.msk [vmem:[#allocation3] sm:$0xff] %vm530_vm11, %v522_v39 }
 0x104   : > { %v805_v45 = vsel %vm497_vm14, 1.0, %v1064_v44  ;;  %v525_v46 = vsel %vm497_vm14, 0.0, %v489_v33  ;;  %v484_v47 = vmul.f32 0.6666667, %v476_v36  ;;  %v450_v48 = vpop.f32.mrf.mxu0 }
 0x105   : > { %534 = vst.msk [vmem:[#allocation3 + $0x18] sm:$0xff] %vm530_vm11, %v525_v46  ;;  %v482_v50 = vmul.f32 0.6666667, %v474_v41  ;;  %v477_v51 = vsub.f32 %v459_v42, %v469_v38  ;;  %v451_v52 = vadd.f32 %v796_v5, %v450_v48  ;;  %vm495_vm15 = vcmp.ge.f32.partialorder %v487_v40, 1.0 }
 0x106   : > { %v492_v53 = vadd.f32 %v484_v47, %v468_v28  ;;  %v803_v55 = vsel %vm495_vm15, 1.0, %v1064_v44  ;;  %v523_v56 = vsel %vm495_vm15, 0.0, %v487_v40  ;;  %v519_v61 = vpack.c.bf16 %v805_v45, %v804_v43 }
 0x107   : > { %v490_v57 = vadd.f32 %v482_v50, %v466_v32  ;;  %v485_v58 = vmul.f32 0.6666667, %v477_v51  ;;  %v475_v59 = vsub.f32 %v451_v52, %v467_v49  ;;  %v518_v60 = vpack.c.bf16 %v803_v55, %v802_v54  ;;  %532 = vst.msk [vmem:[#allocation3 + $0x8] sm:$0xff] %vm530_vm11, %v523_v56 }
 0x108   : > { %vm500_vm0 = vcmp.ge.f32.partialorder %v492_v53, 1.0 }
 0x109   : > { %v528_v62 = vsel %vm500_vm0, 0.0, %v492_v53  ;;  %vm498_vm1 = vcmp.ge.f32.partialorder %v490_v57, 1.0  ;;  %v493_v63 = vadd.f32 %v485_v58, %v469_v38  ;;  %883 = vmatprep.mubr.msk.bf16.mxu1 %vm530_vm11, %v518_v60  ;;  %v483_v1 = vmul.f32 0.6666667, %v475_v59 }
 0x10a   : > { %537 = vst.msk [vmem:[#allocation3 + $0x30] sm:$0xff] %vm530_vm11, %v528_v62  ;;  %v526_v0 = vsel %vm498_vm1, 0.0, %v490_v57  ;;  %884 = vmatmul.mubr.msk.bf16.vlgmr.msra.gmra.mxu1 %vm530_vm11, %v519_v61  ;;  %v806_v5 = vsel %vm498_vm1, 1.0, %v1064_v44  ;;  %v808_v8 = vsel %vm500_vm0, 1.0, %v1064_v44 }
 0x10b   : > { %535 = vst.msk [vmem:[#allocation3 + $0x20] sm:$0xff] %vm530_vm11, %v526_v0  ;;  %vm501_vm2 = vcmp.ge.f32.partialorder %v493_v63, 1.0  ;;  %v491_v3 = vadd.f32 %v483_v1, %v467_v49 }
 0x10c   : > { %v529_v2 = vsel %vm501_vm2, 0.0, %v493_v63  ;;  %v809_v4 = vsel %vm501_vm2, 1.0, %v1064_v44 }
 0x10d   : > { %538 = vst.msk [vmem:[#allocation3 + $0x38] sm:$0xff] %vm530_vm11, %v529_v2  ;;  %vm499_vm3 = vcmp.ge.f32.partialorder %v491_v3, 1.0  ;;  %v521_v10 = vpack.c.bf16 %v809_v4, %v808_v8 }
 0x10e   : > { %v807_v6 = vsel %vm499_vm3, 1.0, %v1064_v44  ;;  %v527_v7 = vsel %vm499_vm3, 0.0, %v491_v3 }
 0x10f   : > { %536 = vst.msk [vmem:[#allocation3 + $0x28] sm:$0xff] %vm530_vm11, %v527_v7  ;;  %v520_v9 = vpack.c.bf16 %v807_v6, %v806_v5 }
 0x111   : > { %887 = vmatprep.mubr.msk.bf16.mxu1 %vm530_vm11, %v520_v9 }
 0x112   : > { %888 = vmatmul.mubr.msk.bf16.gmra.mxu1 %vm530_vm11, %v521_v10 }
 0x1ca   : > { %v885_v12 = vpop.f32.mrf.mxu1 }
 0x1cb   : > { %v617_v13 = vadd.f32 %v885_v12, %v810_v11 }
 0x1cc   : > { %v608_v14 = vpop.f32.mrf.mxu1 }
 0x1cd   : > { %v833_v44 = vpack.c.bf16 %v617_v13, %v617_v13  ;;  %v609_v15 = vadd.f32 %v810_v11, %v608_v14 }
 0x1ce   : > { %v886_v16 = vpop.f32.mrf.mxu1 }
 0x1cf   : > { %674 = vst.msk [vmem:[%s1184_s10 + $0x8] sm:$0xf] %vm671_vm4, %v833_v44  ;;  %v831_v17 = vpack.c.bf16 %v609_v15, %v609_v15  ;;  %v620_v18 = vadd.f32 %v886_v16, %v810_v11 }
 0x1d0   : > { %v611_v19 = vpop.f32.mrf.mxu1 }
 0x1d1   : > { %672 = vst.msk [vmem:[%s1184_s10] sm:$0xf] %vm671_vm4, %v831_v17  ;;  %v834_v20 = vpack.c.bf16 %v620_v18, %v620_v18  ;;  %v612_v21 = vadd.f32 %v810_v11, %v611_v19 }
 0x1d2   : > { %v889_v23 = vpop.f32.mrf.mxu1 }
 0x1d3   : > { %675 = vst.msk [vmem:[%s1184_s10 + $0xc] sm:$0xf] %vm671_vm4, %v834_v20  ;;  %v832_v22 = vpack.c.bf16 %v612_v21, %v612_v21  ;;  %v633_v24 = vadd.f32 %v889_v23, %v810_v11 }
 0x1d4   : > { %v624_v25 = vpop.f32.mrf.mxu1 }
 0x1d5   : > { %673 = vst.msk [vmem:[%s1184_s10 + $0x4] sm:$0xf] %vm671_vm4, %v832_v22  ;;  %v837_v26 = vpack.c.bf16 %v633_v24, %v633_v24  ;;  %v625_v27 = vadd.f32 %v810_v11, %v624_v25 }
 0x1d6   : > { %v890_v28 = vpop.f32.mrf.mxu1 }
 0x1d7   : > { %678 = vst.msk [vmem:[%s1184_s10 + $0x18] sm:$0xf] %vm671_vm4, %v837_v26  ;;  %v835_v29 = vpack.c.bf16 %v625_v27, %v625_v27  ;;  %v636_v30 = vadd.f32 %v890_v28, %v810_v11 }
 0x1d8   : > { %v627_v31 = vpop.f32.mrf.mxu1 }
 0x1d9   : > { %676 = vst.msk [vmem:[%s1184_s10 + $0x10] sm:$0xf] %vm671_vm4, %v835_v29  ;;  %v838_v32 = vpack.c.bf16 %v636_v30, %v636_v30  ;;  %v628_v33 = vadd.f32 %v810_v11, %v627_v31 }
 0x1db   : > { %679 = vst.msk [vmem:[%s1184_s10 + $0x1c] sm:$0xf] %vm671_vm4, %v838_v32  ;;  %v836_v34 = vpack.c.bf16 %v628_v33, %v628_v33 }
 0x1dd   : > { %677 = vst.msk [vmem:[%s1184_s10 + $0x14] sm:$0xf] %vm671_vm4, %v836_v34 }
 0x1de   : > { %982 = shalt.err (!%p979_p9)
}
 0x1df   : > { %s983_s12 = scalar_lea.hbm %s1278_s13, 512  ;;  %s987_s14 = scalar_lea.hbm %s1344_s5, 4096 }
 0x1e0   : > { %p984_p10 = scmp.ne.s32.totalorder %s1278_s13, %s983_s12  ;;  %p988_p13 = scmp.lt.s32.totalorder %s1278_s13, %s1344_s5 }
 0x1e1   : > { %p989_p0 = scmp.lt.s32.totalorder %s987_s14, %s983_s12 }
 0x1e2   : > { %p985_p11 = pnand %p984_p10, %p1149_p3 }
 0x1e3   : > { %p990_p1 = por %p989_p0, %p988_p13 }
 0x1e4   : > { %p986_p12 = pneg %p985_p11 }
 0x1e6   : > { %p991_p2 = pnand %p990_p1, %p986_p12 }
 0x1e8   : > { %994 = shalt.err (!%p991_p2)
}
 0x1e9   : > { %s1066_s17 = smov 64   ;;  %s1067_s27 = smov 4  }
 0x1ea   : > { %891 = dma.vmem_to_hbm [thread:$0]  (%p1149_p3), %s1280_s15, 512, %s1278_s13, %s1288_s26, %s1066_s17, %s1066_s17, %s1067_s27  }
 0x1eb PF: > { %p897_p4 = scmp.ge.s32.totalorder %s1061_s25, 2  ;;  %s711_s30 = sand.u32 1, %s1033_s18  }
 0x1ec   : > { %s712_s8 = scalar_lea.sflag [#allocation5], %s711_s30 }
 0x1ed   : > { %p894_p5 = pnand %p897_p4, %p1158_p8 }
 0x1ef   : > { %p895_p6 = pneg %p894_p5 }
 0x1f1   : > { %1028 = dma.done.wait (%p895_p6), %s712_s8, 512  }
 0x1f2   : > { %1030 = vsyncadd (%p895_p6), %s712_s8, 4294966784  ;;  %s18_s25 = sadd.s32 1, %s1061_s25   ;;  %s1347_s18 = smov %s1037_s19 }
 0x1f3   : > { %p15_p7 = scmp.ge.s32.totalorder %s18_s25, 10   ;;  %s1348_s19 = smov %s1041_s20 }
 0x1f4   : > { %s1349_s20 = smov %s1167_s11  ;;  %s1350_s21 = smov %s1053_s23 }
 0x1f5   : > { %s1351_s22 = smov %s1057_s24  ;;  %s1352_s23 = smov %s1355_s28 }
 0x1f6   : > { %s1353_s24 = smov %s1359_s29  ;;  %17 = sbr.rel (!%p15_p7) target bundleno = 5 (0x5), region = 79 }
 0x1fb   :  { %717 = vsyncpa [#allocation5], 1 }
 0x1fc   :  { %719 = vsyncpa [#allocation5 + $0x1], 1 }

</bundles_post_ra>
